<compile_context>
chip_gen: v6e
topology: v6e:2x2x1
jax: 0.10.0
libtpu: 0.0.40
codegen_flags: <defaults>
</compile_context>

<pallas_src>
import jax
import jax.numpy as jnp
from jax.experimental import pallas as pl
from jax.experimental.pallas import tpu as pltpu

_LANE = 128
_MAX_CHUNKS = 8                # max outstanding DMAs per call
_MIN_CHUNK_BYTES = 1 << 20     # don't bother chunking below ~1 MiB / chunk


def _chunk_bounds(rows: int, want_chunks: int):
    """Static (start, size) row ranges covering [0, rows)."""
    nchunks = max(1, min(want_chunks, rows))
    base, rem = divmod(rows, nchunks)
    bounds, start = [], 0
    for c in range(nchunks):
        size = base + (1 if c < rem else 0)
        bounds.append((start, size))
        start += size
    return bounds


def _dma_copy(x: jax.Array, bounds=None) -> jax.Array:
    """HBM->HBM copy of `x` via async DMA(s).

    bounds=None        -> one whole-ref copy (any shape, any element count).
    bounds=[(s0,n0),..]-> chunked copy along the leading axis; all chunks are
                          issued back-to-back, then waited on, so the
                          transfers overlap.
    """
    nbytes = x.size * jnp.dtype(x.dtype).itemsize
    nchunks = 1 if bounds is None else len(bounds)

    def kernel(x_hbm, o_hbm, sem):
        copies = []
        if bounds is None:
            copies.append(pltpu.make_async_copy(x_hbm, o_hbm, sem.at[0]))
        else:
            for c, (start, size) in enumerate(bounds):
                copies.append(pltpu.make_async_copy(
                    x_hbm.at[pl.ds(start, size)],
                    o_hbm.at[pl.ds(start, size)],
                    sem.at[c]))
        for cp in copies:
            cp.start()           # issue every DMA first ...
        for cp in copies:
            cp.wait()            # ... then wait, keeping them all in flight

    return pl.pallas_call(
        kernel,
        out_shape=jax.ShapeDtypeStruct(x.shape, x.dtype),
        in_specs=[pl.BlockSpec(memory_space=pl.ANY)],
        out_specs=pl.BlockSpec(memory_space=pl.ANY),
        scratch_shapes=[pltpu.SemaphoreType.DMA((nchunks,))],
        cost_estimate=pl.CostEstimate(
            flops=0, transcendentals=0, bytes_accessed=2 * nbytes),
    )(x)


def identity(x: jax.Array, donate: bool = False) -> jax.Array:
    """Identity.forward(x) -> x.

    donate=True (or empty input) returns x unchanged -- the true no-op.
    Otherwise a fresh buffer is produced through a direct HBM->HBM DMA copy
    kernel (no VMEM staging, no grid loop).
    """
    if donate or x.size == 0:
        return x

    n = x.size
    nbytes = n * jnp.dtype(x.dtype).itemsize
    want_chunks = max(1, min(_MAX_CHUNKS, nbytes // _MIN_CHUNK_BYTES))

    if want_chunks > 1 and n % _LANE == 0:
        # Large, lane-divisible tensor: flat (rows, 128) view (a free bitcast
        # of the contiguous buffer) chunked along rows into a few concurrent
        # DMAs.
        rows = n // _LANE
        x2d = x.reshape(rows, _LANE)
        out2d = _dma_copy(x2d, _chunk_bounds(rows, want_chunks))
        return out2d.reshape(x.shape)

    # Small tensors and ragged element counts: one whole-ref DMA of the array
    # in its original shape -- no pad, no slice, no reshape round trips.
    return _dma_copy(x)


if __name__ == "__main__":
    key = jax.random.PRNGKey(0)

    # Small NCHW-style input consistent with an image-captioning pipeline.
    x = jax.random.normal(key, (2, 4, 16, 16), dtype=jnp.float32)
    y = identity(x)
    jax.block_until_ready(y)
    assert y.shape == x.shape and y.dtype == x.dtype
    assert bool(jnp.array_equal(y, x))

    # Donated / aliased path: true no-op, returns the input itself.
    y2 = identity(x, donate=True)
    jax.block_until_ready(y2)
    assert y2 is x and bool(jnp.array_equal(y2, x))

    # bf16 path.
    xb = jax.random.normal(jax.random.PRNGKey(1), (2, 3, 32, 40),
                           dtype=jnp.bfloat16)
    yb = identity(xb)
    jax.block_until_ready(yb)
    assert yb.dtype == xb.dtype and bool(jnp.array_equal(yb, xb))

    # Ragged element count (not a multiple of 128): whole-ref DMA, no padding.
    xr = jax.random.normal(jax.random.PRNGKey(2), (3, 5, 7), dtype=jnp.float32)
    yr = identity(xr)
    jax.block_until_ready(yr)
    assert bool(jnp.array_equal(yr, xr))

    # ~2 MiB tensor exercises the chunked multi-DMA path (2 chunks).
    xl = jax.random.normal(jax.random.PRNGKey(3), (4, 128, 1024),
                           dtype=jnp.float32)
    yl = identity(xl)
    jax.block_until_ready(yl)
    assert yl.shape == xl.shape and bool(jnp.array_equal(yl, xl))

    print("KERNEL_OK")
</pallas_src>

<mosaic_0001>
module attributes {stable_mosaic.version = 11 : i64} {
  func.func @kernel(%arg0: memref<2x4x16x16xf32, #tpu.memory_space<any>>, %arg1: memref<2x4x16x16xf32, #tpu.memory_space<any>>, %arg2: memref<1x!tpu.dma_semaphore, #tpu.memory_space<semaphore_mem>>) attributes {dimension_semantics = [], scalar_prefetch = 0 : i64, scratch_operands = 1 : i64, tpu.core_type = #tpu.core_type<tc>} {
    %c0_i32 = arith.constant 0 : i32
    %0 = tpu.memref_slice %arg2[%c0_i32] : memref<1x!tpu.dma_semaphore, #tpu.memory_space<semaphore_mem>> -> memref<1x!tpu.dma_semaphore, #tpu.memory_space<semaphore_mem>>
    %1 = tpu.memref_squeeze %0 : memref<1x!tpu.dma_semaphore, #tpu.memory_space<semaphore_mem>> -> memref<!tpu.dma_semaphore, #tpu.memory_space<semaphore_mem>>
    tpu.enqueue_dma source(%arg0 : memref<2x4x16x16xf32, #tpu.memory_space<any>>) target(%arg1 : memref<2x4x16x16xf32, #tpu.memory_space<any>>) target_semaphore(%1 : memref<!tpu.dma_semaphore, #tpu.memory_space<semaphore_mem>>)
    %c0_i32_0 = arith.constant 0 : i32
    %2 = tpu.memref_slice %arg2[%c0_i32_0] : memref<1x!tpu.dma_semaphore, #tpu.memory_space<semaphore_mem>> -> memref<1x!tpu.dma_semaphore, #tpu.memory_space<semaphore_mem>>
    %3 = tpu.memref_squeeze %2 : memref<1x!tpu.dma_semaphore, #tpu.memory_space<semaphore_mem>> -> memref<!tpu.dma_semaphore, #tpu.memory_space<semaphore_mem>>
    tpu.wait_dma2 semaphore(%3 : memref<!tpu.dma_semaphore, #tpu.memory_space<semaphore_mem>>) src(%arg0 : memref<2x4x16x16xf32, #tpu.memory_space<any>>) dst(%arg1 : memref<2x4x16x16xf32, #tpu.memory_space<any>>)
    return
  }
}

</mosaic_0001>

<bundles_post_ra>
// kernel: tpu_custom_call.1
= control target key start
LH: loop header
LB: loop body
LE: loop exit
PB: predicated region body
PF: predicated region fallthrough
CT: control target
= control target key end

     0   :  { %s30_s6 = smov [#allocation2]   ;;  %s31_s7 = smov 131072   ;;  %s49_s0 = inlined_call_operand.hbm [shape: f32[2,4,16,16], index: 0, kind: input, shape index: {}]   ;;  %s50_s1 = inlined_call_operand.hbm [shape: f32[2,4,16,16], index: 1, kind: output, shape index: {}]  }
   0x1   :  { %s32_s8 = smov 0  }
   0x2   :  { %12 = dma.general %s49_s0, 2048, %s50_s1, %s30_s6, %s31_s7, [#allocation4], %s32_s8, 0  }
   0x3   :  { %28 = dma.done.wait [#allocation2], 2048 }
   0x4   :  { %29 = vsyncadd [#allocation2], 4294965248 }
   0x5   :  { %18 = vsyncmov [#allocation2] }
   0x8   :  { %s19_s13 = vpop.sfrf %18 }
   0x9   :  { %p24_p0 = scmp.ne.s32.totalorder %s19_s13, 0 }
   0xb   :  { %23 = shalt.err (%p24_p0)  }

</bundles_post_ra>
